<compile_context>
chip_gen: v6e
topology: v6e:2x2x1
jax: 0.10.0
libtpu: 0.0.40
codegen_flags: <defaults>
</compile_context>

<pallas_src>
import jax
import jax.numpy as jnp
from jax.experimental import pallas as pl
from jax.experimental.pallas import tpu as pltpu


def _round_up(x, m):
    return (x + m - 1) // m * m


def _vmem_capacity_bytes():
    """Physical VMEM per TensorCore; conservative fallback if query fails."""
    try:
        return int(pltpu.get_tpu_info().vmem_capacity_bytes)
    except Exception:
        return 64 * 1024 * 1024  # v7x per-TC size: safe lower bound everywhere.


# ---------------------------------------------------------------------------
# Kernels
# ---------------------------------------------------------------------------
def _make_kernel(has_bias: bool, multi_k: bool):
    """Build the kernel body for (bias?, K-accumulation?) combination."""
    if multi_k:
        def kernel(x_ref, w_ref, *rest):
            # x_ref: (tm, tk), w_ref: (tk, tn)  -- contraction ((1,),(0,)),
            # the canonical MXU layout: no in-kernel transpose.
            if has_bias:
                b_ref, o_ref, acc_ref = rest
            else:
                o_ref, acc_ref = rest
                b_ref = None

            @pl.when(pl.program_id(2) == 0)
            def _():
                acc_ref[...] = jnp.zeros_like(acc_ref)

            acc_ref[...] += jnp.dot(x_ref[...], w_ref[...],
                                    preferred_element_type=jnp.float32)

            @pl.when(pl.program_id(2) == pl.num_programs(2) - 1)
            def _():
                r = acc_ref[...]
                if has_bias:
                    r = r + b_ref[...]          # (1, tn) broadcast, f32
                o_ref[...] = r.astype(o_ref.dtype)
    else:
        def kernel(x_ref, w_ref, *rest):
            # Single K tile: no accumulator scratch, no phases.
            if has_bias:
                b_ref, o_ref = rest
            else:
                (o_ref,) = rest
                b_ref = None
            r = jnp.dot(x_ref[...], w_ref[...],
                        preferred_element_type=jnp.float32)
            if has_bias:
                r = r + b_ref[...]
            o_ref[...] = r.astype(o_ref.dtype)
    return kernel


# ---------------------------------------------------------------------------
# Tile planning (per TPU generation) & operand preparation
# ---------------------------------------------------------------------------
def _plan_tiles(out_f, in_f, compute_dtype, *, max_tm=256):
    cdt = jnp.dtype(compute_dtype)
    itemsize = cdt.itemsize
    sub = 8 * max(1, 4 // itemsize)          # sublane granularity (8 f32 / 16 bf16)

    vmem_cap = _vmem_capacity_bytes()
    vmem_limit = int(vmem_cap * 0.75)        # raise scoped VMEM (v5e default 16 MiB)
    budget = int(vmem_limit * 0.85)          # cap for double-buffered footprint

    tm = max_tm
    tn = min(1024, _round_up(out_f, 128))    # lane-dense (multiples of 128)
    tk = min(2048, _round_up(in_f, 128))

    def footprint(tm, tn, tk):
        # double-buffered x & W streams + double-buffered f32 out + f32 acc + bias
        return (2 * (tm * tk + tk * tn) * itemsize
                + 2 * tm * tn * 4 + tm * tn * 4 + 2 * tn * 4)

    while footprint(tm, tn, tk) > budget:
        if tk > 128:
            tk = max(128, _round_up(tk // 2, 128))
        elif tn > 128:
            tn = max(128, _round_up(tn // 2, 128))
        elif tm > sub:
            tm = max(sub, tm // 2)
        else:
            break
    return tm, tn, tk, vmem_limit


def _prepare_weight(weight, mask, tn, tk, compute_dtype):
    """(W * mask)^T cast + zero-padded to (Kp, Np).  Do this ONCE per module."""
    out_f, in_f = weight.shape
    Np = _round_up(out_f, tn)
    Kp = _round_up(in_f, tk)
    wt = (weight * mask).T.astype(compute_dtype)          # (in_f, out_f)
    if (Kp, Np) == (in_f, out_f):
        return wt                                          # fast path: no copy
    return jnp.zeros((Kp, Np), compute_dtype).at[:in_f, :out_f].set(wt)


def _prepare_bias(bias, tn):
    if bias is None:
        return None
    (out_f,) = bias.shape
    Np = _round_up(out_f, tn)
    bp = bias.astype(jnp.float32).reshape(1, out_f)
    if Np == out_f:
        return bp
    return jnp.zeros((1, Np), jnp.float32).at[:, :out_f].set(bp)


def _prepare_x(x, tm, tk, compute_dtype):
    B, in_f = x.shape
    Mp = _round_up(B, tm)
    Kp = _round_up(in_f, tk)
    xc = x.astype(compute_dtype)
    if (Mp, Kp) == (B, in_f):
        return xc                                          # fast path: no copy
    return jnp.zeros((Mp, Kp), compute_dtype).at[:B, :in_f].set(xc)


# ---------------------------------------------------------------------------
# pallas_call wrapper on pre-padded operands
# ---------------------------------------------------------------------------
def _masked_linear_padded(xp, wp, bp, *, tm, tn, tk, out_dtype, vmem_limit,
                          w_buffers=None):
    Mp, Kp = xp.shape
    Kp2, Np = wp.shape
    assert Kp == Kp2
    gm, gn, gk = Mp // tm, Np // tn, Kp // tk
    has_bias = bp is not None
    multi_k = gk > 1
    # v7x (2 TC/chip): keep the leading "parallel" axis non-degenerate so both
    # cores get blocks when the batch fits in a single M tile.
    n_major = (gm == 1 and gn > 1)

    if n_major:
        grid = (gn, gm, gk)
        x_map = lambda j, i, k: (i, k)
        w_map = lambda j, i, k: (k, j)
        b_map = lambda j, i, k: (0, j)
        o_map = lambda j, i, k: (i, j)
    else:
        grid = (gm, gn, gk)
        x_map = lambda i, j, k: (i, k)
        w_map = lambda i, j, k: (k, j)
        b_map = lambda i, j, k: (0, j)
        o_map = lambda i, j, k: (i, j)

    w_kwargs = {}
    if w_buffers is not None and w_buffers > 2 and multi_k:
        w_kwargs["pipeline_mode"] = pl.Buffered(w_buffers)

    in_specs = [pl.BlockSpec((tm, tk), x_map),
                pl.BlockSpec((tk, tn), w_map, **w_kwargs)]
    operands = [xp, wp]
    if has_bias:
        in_specs.append(pl.BlockSpec((1, tn), b_map))
        operands.append(bp)

    scratch = [pltpu.VMEM((tm, tn), jnp.float32)] if multi_k else []

    return pl.pallas_call(
        _make_kernel(has_bias, multi_k),
        out_shape=jax.ShapeDtypeStruct((Mp, Np), out_dtype),
        grid_spec=pltpu.PrefetchScalarGridSpec(
            num_scalar_prefetch=0,
            grid=grid,
            in_specs=in_specs,
            out_specs=pl.BlockSpec((tm, tn), o_map),
            scratch_shapes=scratch,
        ),
        compiler_params=pltpu.CompilerParams(
            dimension_semantics=("parallel", "parallel", "arbitrary"),
            vmem_limit_bytes=vmem_limit),
    )(*operands)


# ---------------------------------------------------------------------------
# Public APIs
# ---------------------------------------------------------------------------
class MaskedLinearPallas:
    """Persistent module: masked+cast+padded+transposed weight built once."""

    def __init__(self, weight, mask, bias=None, *, compute_dtype=jnp.bfloat16,
                 w_buffers=None):
        self.out_features, self.in_features = weight.shape
        self.compute_dtype = jnp.dtype(compute_dtype)
        self._sub = 8 * max(1, 4 // self.compute_dtype.itemsize)
        (self._tm_max, self._tn, self._tk,
         self._vmem_limit) = _plan_tiles(self.out_features, self.in_features,
                                         self.compute_dtype)
        self._wp = _prepare_weight(weight, mask, self._tn, self._tk,
                                   self.compute_dtype)
        self._bp = _prepare_bias(bias, self._tn)
        self._w_buffers = w_buffers

    def __call__(self, x):
        B, in_f = x.shape
        assert in_f == self.in_features
        tm = min(self._tm_max, _round_up(B, self._sub))
        xp = _prepare_x(x, tm, self._tk, self.compute_dtype)
        out = _masked_linear_padded(
            xp, self._wp, self._bp, tm=tm, tn=self._tn, tk=self._tk,
            out_dtype=x.dtype, vmem_limit=self._vmem_limit,
            w_buffers=self._w_buffers)
        return out[:B, :self.out_features]


def masked_linear(x, weight, mask, bias=None, *, compute_dtype=jnp.bfloat16,
                  tm=None, tn=None, tk=None, w_buffers=None):
    """One-shot: y = x @ (weight * mask).T + bias  (F.linear semantics)."""
    B, in_f = x.shape
    out_f, in_f2 = weight.shape
    assert in_f == in_f2
    cdt = jnp.dtype(compute_dtype)
    sub = 8 * max(1, 4 // cdt.itemsize)
    tm_p, tn_p, tk_p, vmem_limit = _plan_tiles(out_f, in_f, cdt)
    tm = min(tm_p, _round_up(B, sub)) if tm is None else tm
    tn = tn_p if tn is None else tn
    tk = tk_p if tk is None else tk

    wp = _prepare_weight(weight, mask, tn, tk, cdt)
    bp = _prepare_bias(bias, tn)
    xp = _prepare_x(x, tm, tk, cdt)
    out = _masked_linear_padded(xp, wp, bp, tm=tm, tn=tn, tk=tk,
                                out_dtype=x.dtype, vmem_limit=vmem_limit,
                                w_buffers=w_buffers)
    return out[:B, :out_f]


def init_params(key, in_features, out_features):
    kw, km = jax.random.split(key)
    limit = jnp.sqrt(6.0 / (in_features + out_features))   # xavier_uniform_
    weight = jax.random.uniform(kw, (out_features, in_features),
                                jnp.float32, minval=-limit, maxval=limit)
    mask = (jax.random.uniform(km, (out_features, in_features)) > 0.5
            ).astype(jnp.float32)
    weight = weight * mask                                  # reset_parameters()
    bias = jnp.zeros((out_features,), jnp.float32)
    return weight, mask, bias


if __name__ == "__main__":
    key = jax.random.PRNGKey(0)
    kx, kp, kx2, kp2 = jax.random.split(key, 4)

    # --- Small case (tiny layer like the module), persistent module path ---
    batch, in_features, out_features = 8, 32, 16
    x = jax.random.normal(kx, (batch, in_features), jnp.float32)
    weight, mask, bias = init_params(kp, in_features, out_features)
    wm = weight * mask

    layer = MaskedLinearPallas(weight, mask, bias)          # bf16 operands, f32 acc
    out = jax.block_until_ready(layer(x))
    ref_bf16 = jnp.dot(x.astype(jnp.bfloat16), wm.astype(jnp.bfloat16).T,
                       preferred_element_type=jnp.float32) + bias
    assert out.shape == (batch, out_features)
    assert jnp.allclose(out, ref_bf16, atol=1e-2, rtol=1e-2)

    # --- Same case, f32 compute path (tight check) -------------------------
    out_f32 = jax.block_until_ready(
        masked_linear(x, weight, mask, bias, compute_dtype=jnp.float32))
    ref_f32 = x @ wm.T + bias
    assert jnp.allclose(out_f32, ref_f32, atol=2e-3, rtol=2e-3)

    # --- No-bias variant ----------------------------------------------------
    out_nb = jax.block_until_ready(masked_linear(x, weight, mask, None))
    ref_nb = jnp.dot(x.astype(jnp.bfloat16), wm.astype(jnp.bfloat16).T,
                     preferred_element_type=jnp.float32)
    assert jnp.allclose(out_nb, ref_nb, atol=1e-2, rtol=1e-2)

    # --- Multi-tile grid: forces K accumulation + N-major (megacore) order --
    B2, in2, out2 = 16, 384, 512
    x2 = jax.random.normal(kx2, (B2, in2), jnp.float32)
    w2, m2, b2 = init_params(kp2, in2, out2)
    out_big = jax.block_until_ready(
        masked_linear(x2, w2, m2, b2, compute_dtype=jnp.float32,
                      tn=128, tk=128))       # grid = (4, 1, 3): n-major, multi-K
    ref_big = jnp.dot(x2, (w2 * m2).T,
                      precision=jax.lax.Precision.HIGHEST) + b2
    assert out_big.shape == (B2, out2)
    assert jnp.allclose(out_big, ref_big, atol=2e-3, rtol=2e-3)

    print("KERNEL_OK")
</pallas_src>

<mosaic_0001>
module attributes {stable_mosaic.version = 11 : i64} {
  func.func @kernel(%arg0: i32, %arg1: i32, %arg2: i32, %arg3: memref<16x128xbf16, #tpu.memory_space<vmem>>, %arg4: memref<128x128xbf16, #tpu.memory_space<vmem>>, %arg5: memref<1x128xf32, #tpu.memory_space<vmem>>, %arg6: memref<16x128xf32, #tpu.memory_space<vmem>>) attributes {dimension_semantics = [#tpu.dimension_semantics<parallel>, #tpu.dimension_semantics<parallel>, #tpu.dimension_semantics<arbitrary>], iteration_bounds = array<i64: 1, 1, 1>, scalar_prefetch = 0 : i64, scratch_operands = 0 : i64, tpu.core_type = #tpu.core_type<tc>, window_params = [{transform_indices = @transform_0, window_bounds = array<i64: 16, 128>}, {transform_indices = @transform_1, window_bounds = array<i64: 128, 128>}, {transform_indices = @transform_2, window_bounds = array<i64: 1, 128>}, {transform_indices = @transform_3, window_bounds = array<i64: 16, 128>}]} {
    %c0 = arith.constant 0 : index
    %c0_0 = arith.constant 0 : index
    %0 = vector.load %arg3[%c0, %c0_0] : memref<16x128xbf16, #tpu.memory_space<vmem>>, vector<16x128xbf16>
    %c0_1 = arith.constant 0 : index
    %c0_2 = arith.constant 0 : index
    %1 = vector.load %arg4[%c0_1, %c0_2] : memref<128x128xbf16, #tpu.memory_space<vmem>>, vector<128x128xbf16>
    %cst = arith.constant dense<0.000000e+00> : vector<16x128xf32>
    %2 = tpu.matmul %0, %1, %cst {dimension_numbers = #tpu.dot_dimension_numbers<[1], [0], [0], [1], [0, 0, 1, 1], [], []>} : vector<16x128xbf16>, vector<128x128xbf16>, vector<16x128xf32> -> vector<16x128xf32>
    %c0_3 = arith.constant 0 : index
    %c0_4 = arith.constant 0 : index
    %3 = vector.load %arg5[%c0_3, %c0_4] : memref<1x128xf32, #tpu.memory_space<vmem>>, vector<1x128xf32>
    %4 = vector.broadcast %3 : vector<1x128xf32> to vector<16x128xf32>
    %5 = arith.addf %2, %4 : vector<16x128xf32>
    %c0_5 = arith.constant 0 : index
    %c0_6 = arith.constant 0 : index
    %6 = vector.load %arg6[%c0_5, %c0_6] : memref<16x128xf32, #tpu.memory_space<vmem>>, vector<16x128xf32>
    tpu.vector_store %arg6[%c0_5, %c0_6], %5 {strides = array<i32>} : memref<16x128xf32, #tpu.memory_space<vmem>>, vector<16x128xf32>,
    return
  }
  func.func @transform_0(%arg0: i32, %arg1: i32, %arg2: i32) -> (i32, i32) {
    %c0_i32 = arith.constant 0 : i32
    return %arg0, %arg2 : i32, i32
  }
  func.func @transform_1(%arg0: i32, %arg1: i32, %arg2: i32) -> (i32, i32) {
    %c0_i32 = arith.constant 0 : i32
    return %arg2, %arg1 : i32, i32
  }
  func.func @transform_2(%arg0: i32, %arg1: i32, %arg2: i32) -> (i32, i32) {
    %c0_i32 = arith.constant 0 : i32
    %c0_i32_0 = arith.constant 0 : i32
    return %c0_i32, %arg1 : i32, i32
  }
  func.func @transform_3(%arg0: i32, %arg1: i32, %arg2: i32) -> (i32, i32) {
    %c0_i32 = arith.constant 0 : i32
    return %arg0, %arg1 : i32, i32
  }
}

</mosaic_0001>

<bundles_post_ra>
// kernel: tpu_custom_call.1
= control target key start
LH: loop header
LB: loop body
LE: loop exit
PB: predicated region body
PF: predicated region fallthrough
CT: control target
= control target key end

     0   :  { %8 = vsyncpa [#allocation3], 0  ;;  %s348_s0 = inlined_call_operand.hbm [shape: bf16[16,128], index: 0, kind: input, shape index: {}]   ;;  %s349_s1 = inlined_call_operand.hbm [shape: bf16[128,128], index: 1, kind: input, shape index: {}]   ;;  %s350_s2 = inlined_call_operand.vmem [shape: f32[1,128], index: 2, kind: input, shape index: {}]   ;;  %s351_s3 = inlined_call_operand.hbm [shape: f32[16,128], index: 3, kind: output, shape index: {}]  }
   0x1   :  { %9 = vsyncpa [#allocation6], 0 }
   0x2   :  { %10 = vsyncpa [#allocation4], 0  ;;  %s307_s12 = smov [#allocation2]  }
   0x3   :  { %s16_s13 = sshll.u32 %s307_s12, 4  ;;  %s17_s13 = int_to_ptr.vmem [resolvable:$true] %s16_s13 }
   0x4   :  { %s249_s14 = scalar_lea.vmem %s17_s13, 128  ;;  %p254_p1 = scmp.lt.s32.totalorder %s17_s13, %s17_s13 }
   0x5   :  { %p250_p0 = scmp.ne.s32.totalorder %s17_s13, %s249_s14  ;;  %p255_p2 = scmp.lt.s32.totalorder %s249_s14, %s249_s14 }
   0x7   :  { %p256_p3 = por %p255_p2, %p254_p1 }
   0x9   :  { %p257_p4 = pnand %p256_p3, %p250_p0 }
   0xb   :  { %260 = shalt.err (!%p257_p4)
}
   0xc   :  { %s308_s15 = smov 64   ;;  %s309_s16 = smov 4  }
   0xd   :  { %22 = dma.hbm_to_vmem [thread:$0]  %s348_s0, 128, %s17_s13, [#allocation3], %s308_s15, %s308_s15, %s309_s16  }
   0xe   :  { %s310_s19 = smov [#allocation5]  }
   0xf   :  { %s28_s20 = sshll.u32 %s310_s19, 4  ;;  %s29_s20 = int_to_ptr.vmem [resolvable:$true] %s28_s20 }
  0x10   :  { %s269_s21 = scalar_lea.vmem %s29_s20, 1024  ;;  %p274_p6 = scmp.lt.s32.totalorder %s29_s20, %s29_s20 }
  0x11   :  { %p270_p5 = scmp.ne.s32.totalorder %s29_s20, %s269_s21  ;;  %p275_p7 = scmp.lt.s32.totalorder %s269_s21, %s269_s21 }
  0x13   :  { %p276_p8 = por %p275_p7, %p274_p6 }
  0x15   :  { %p277_p9 = pnand %p276_p8, %p270_p5 }
  0x17   :  { %280 = shalt.err (!%p277_p9)
}
  0x18   :  { %34 = dma.hbm_to_vmem [thread:$0]  %s349_s1, 1024, %s29_s20, [#allocation6], %s308_s15, %s308_s15, %s309_s16  }
  0x19   :  { %301 = dma.done.wait [#allocation3], 128  }
  0x1a   :  { %302 = vsyncadd [#allocation3], 4294967168 }
  0x1b   :  { %303 = dma.done.wait [#allocation6], 1024  }
  0x1c   :  { %304 = vsyncadd [#allocation6], 4294966272  ;;  %v311_v0 = vmov 0.0   ;;  %vm312_vm0 = vmmov 0   ;;  %v232_v1 = vld [vmem:[#allocation5 + $0x38] sm:$0xff]   ;;  %v233_v2 = vld [vmem:[#allocation5 + $0x30] sm:$0xff]  }
  0x1d   :  { %203 = vmatprep.subr.bf16.mxu0 %v311_v0  ;;  %219 = vmatprep.mubr.msk.bf16.mxu0 %vm312_vm0, %v311_v0  ;;  %v234_v3 = vld [vmem:[#allocation5 + $0x28] sm:$0xff]   ;;  %v235_v4 = vld [vmem:[#allocation5 + $0x20] sm:$0xff]   ;;  %v236_v5 = vld [vmem:[#allocation5 + $0x18] sm:$0xff]   ;;  %s313_s24 = smov [#allocation7]  }
  0x1e   :  { %204 = vmatpush3.bf16.msra.mxu0 %v232_v1  ;;  %v237_v6 = vld [vmem:[#allocation5 + $0x10] sm:$0xff]   ;;  %v238_v7 = vld [vmem:[#allocation5 + $0x8] sm:$0xff]   ;;  %v239_v8 = vld [vmem:[#allocation5] sm:$0xff]   ;;  %s171_s25 = sshll.u32 %s313_s24, 4  ;;  %s172_s25 = int_to_ptr.vmem [resolvable:$true] %s171_s25 }
  0x1f   :  { %205 = vmatprep.subr.bf16.mxu0 %v311_v0  ;;  %v240_v9 = vld [vmem:[#allocation2] sm:$0xff]   ;;  %s281_s26 = scalar_lea.vmem %s172_s25, 256  ;;  %p286_p11 = scmp.lt.s32.totalorder %s172_s25, %s172_s25 }
  0x20   :  { %v184_v10 = vld [vmem:[%s350_s2] ss:$0 sm:$0xff]  ;;  %p282_p10 = scmp.ne.s32.totalorder %s172_s25, %s281_s26  ;;  %p287_p12 = scmp.lt.s32.totalorder %s281_s26, %s281_s26 }
  0x22   :  { %206 = vmatpush3.bf16.msra.mxu0 %v233_v2  ;;  %p288_p13 = por %p287_p12, %p286_p11 }
  0x23   :  { %207 = vmatprep.subr.bf16.mxu0 %v311_v0 }
  0x24   :  { %p289_p0 = pnand %p288_p13, %p282_p10 }
  0x26   :  { %208 = vmatpush3.bf16.msra.mxu0 %v234_v3 }
  0x27   :  { %209 = vmatprep.subr.bf16.mxu0 %v311_v0 }
  0x2a   :  { %210 = vmatpush3.bf16.msra.mxu0 %v235_v4 }
  0x2b   :  { %211 = vmatprep.subr.bf16.mxu0 %v311_v0 }
  0x2e   :  { %212 = vmatpush3.bf16.msra.mxu0 %v236_v5 }
  0x2f   :  { %213 = vmatprep.subr.bf16.mxu0 %v311_v0 }
  0x32   :  { %214 = vmatpush3.bf16.msra.mxu0 %v237_v6 }
  0x33   :  { %215 = vmatprep.subr.bf16.mxu0 %v311_v0 }
  0x36   :  { %216 = vmatpush3.bf16.msra.mxu0 %v238_v7 }
  0x37   :  { %217 = vmatprep.subr.bf16.mxu0 %v311_v0 }
  0x3a   :  { %218 = vmatpush3.bf16.msra.mxu0 %v239_v8 }
  0x3d   :  { %220 = vmatmul.mubr.bf16.vlgmr.msra.gmra.mxu0 %v240_v9 }
  0xfd   :  { %v157_v11 = vpop.f32.mrf.mxu0 }
  0xfe   :  { %v158_v12 = vadd.f32 %v184_v10, %v157_v11 }
  0xff   :  { %v221_v13 = vpop.f32.mrf.mxu0 }
 0x100   :  { %164 = vst [vmem:[#allocation7] sm:$0xff] %v158_v12 }
 0x101   :  { %v160_v14 = vpop.f32.mrf.mxu0 }
 0x102   :  { %v161_v15 = vadd.f32 %v184_v10, %v160_v14 }
 0x103   :  { %v222_v16 = vpop.f32.mrf.mxu0 }
 0x104   :  { %165 = vst [vmem:[#allocation7 + $0x8] sm:$0xff] %v161_v15 }
 0x105   :  { %292 = shalt.err (!%p289_p0)
}
 0x106   :  { %s314_s27 = smov 128   ;;  %s315_s2 = smov 8  }
 0x107   :  { %177 = dma.vmem_to_hbm [thread:$0]  %s172_s25, 256, %s351_s3, [#allocation4], %s314_s27, %s314_s27, %s315_s2  }
 0x108   :  { %305 = dma.done.wait [#allocation4], 256  }
 0x109   :  { %306 = vsyncadd [#allocation4], 4294967040 }
 0x10a   :  { %181 = vsyncpa [#allocation3], 1 }
 0x10b   :  { %182 = vsyncpa [#allocation6], 1 }
 0x10c   :  { %183 = vsyncpa [#allocation4], 1 }

</bundles_post_ra>
